<compile_context>
chip_gen: v7x
topology: tpu7x:2x2x1
jax: 0.10.0
libtpu: 0.0.40
codegen_flags: <defaults>
</compile_context>

<pallas_src>
import functools

import jax
import jax.numpy as jnp
from jax.experimental import pallas as pl
from jax.experimental.pallas import tpu as pltpu

EPS = 1e-5          # nn.InstanceNorm2d default eps
KH, KW = 4, 4
STRIDE = 2
PAD = 1
LANE = 128          # TPU lane width


def _round_up(v, m):
    return (v + m - 1) // m * m


def _conv2d_in_kernel(x_ref, w_ref, o_ref, *, c_out, h_out, w_out, wd, out_w):
    """One batch element: ReLU -> conv (16 tap matmuls) -> InstanceNorm.

    x_ref: (1, 4, C_in, L)      space-to-depth input; axis 1 is the (rh, rw)
                                row/col parity, last axis is the flattened
                                decimated spatial grid (q = a*wd + b), zero
                                padded to L >= out_w + max_shift.
    w_ref: (KH*KW, C_out, C_in) per-tap conv weights.
    o_ref: (1, C_out, out_w)    normalised output; columns q = a*wd + b with
                                a < h_out, b < w_out are valid, the rest is
                                junk the wrapper crops away.
    """
    # Lane mask selecting the valid flattened output positions.
    q = jax.lax.broadcasted_iota(jnp.int32, (1, out_w), 1)
    valid = (q < h_out * wd) & (q % wd < w_out)
    mask = valid.astype(jnp.float32)
    p_valid = float(h_out * w_out)

    acc = jnp.zeros((c_out, out_w), jnp.float32)
    for kh in range(KH):
        for kw in range(KW):
            rh, dh = kh % STRIDE, kh // STRIDE
            rw, dw = kw % STRIDE, kw // STRIDE
            parity = rh * 2 + rw
            shift = dh * wd + dw
            # Static-offset window of the flattened decimated slab for this tap.
            slab = x_ref[0, parity, :, pl.ds(shift, out_w)]      # (C_in, out_w)
            slab = jnp.maximum(slab, 0)                          # ReLU, input dtype
            w_t = w_ref[kh * KW + kw]                            # (C_out, C_in)
            # MXU matmul in the input dtype, f32 accumulation.
            acc = acc + jnp.dot(w_t, slab, preferred_element_type=jnp.float32)

    # Conv bias intentionally omitted: the non-affine InstanceNorm below
    # subtracts the per-channel mean, which cancels any per-channel constant.

    # InstanceNorm2d (affine=False, biased variance): single sweep over y using
    # E[x^2] - E[x]^2 in f32, masked to the valid spatial positions.
    s1 = jnp.sum(acc * mask, axis=1, keepdims=True)              # (C_out, 1)
    s2 = jnp.sum(acc * acc * mask, axis=1, keepdims=True)        # (C_out, 1)
    mean = s1 / p_valid
    var = s2 / p_valid - mean * mean
    o_ref[0] = ((acc - mean) * jax.lax.rsqrt(var + EPS)).astype(o_ref.dtype)


@jax.jit
def conv_2d_forward(x_nchw, weight, bias=None):
    """x_nchw: (N, C_in, H, W); weight: (C_out, C_in, KH, KW); bias: (C_out,).

    `bias` is accepted for API parity but not used: it is mathematically
    cancelled by the non-affine InstanceNorm (see kernel comment).
    """
    del bias  # cancelled by InstanceNorm mean subtraction
    n, c_in, h, w = x_nchw.shape
    c_out = weight.shape[0]
    h_out = (h + 2 * PAD - KH) // STRIDE + 1
    w_out = (w + 2 * PAD - KW) // STRIDE + 1

    # Space-to-depth: split padded rows/cols by parity so every conv tap becomes a
    # contiguous (shift-only) window of a flattened slab.  HBM traffic stays ~1x
    # the input size (vs ~4x for a materialised im2col).
    hp, wp = h + 2 * PAD, w + 2 * PAD
    hp_e, wp_e = _round_up(hp, 2), _round_up(wp, 2)
    hd, wd = hp_e // 2, wp_e // 2

    out_w = _round_up(h_out * wd, LANE)                      # lane-dense output width
    s_max = ((KH - 1) // STRIDE) * wd + (KW - 1) // STRIDE   # largest in-kernel shift
    l_in = _round_up(out_w + s_max, 8)                       # lane extent of input slabs

    xp = jnp.pad(x_nchw, ((0, 0), (0, 0),
                          (PAD, PAD + hp_e - hp), (PAD, PAD + wp_e - wp)))
    xd = xp.reshape(n, c_in, hd, 2, wd, 2)                   # [n, c, a, rh, b, rw]
    xd = jnp.transpose(xd, (0, 3, 5, 1, 2, 4))               # [n, rh, rw, c, a, b]
    xd = xd.reshape(n, 4, c_in, hd * wd)                     # parity = rh*2+rw, q = a*wd+b
    xd = jnp.pad(xd, ((0, 0), (0, 0), (0, 0), (0, l_in - hd * wd)))

    # (C_out, C_in, KH, KW) -> (KH*KW, C_out, C_in): one small weight matrix per tap.
    w_taps = jnp.transpose(weight, (2, 3, 0, 1)).reshape(KH * KW, c_out, c_in)

    # vmem_limit sized to (double-buffered input block + double-buffered output
    # block + resident weights) with generous headroom.
    itemsize = jnp.dtype(x_nchw.dtype).itemsize
    working_set = (2 * 4 * c_in * l_in * itemsize
                   + 2 * c_out * out_w * itemsize
                   + KH * KW * c_out * c_in * itemsize)
    vmem_limit = int(min(96 * 2 ** 20, max(16 * 2 ** 20, 8 * working_set)))

    kernel = functools.partial(_conv2d_in_kernel, c_out=c_out, h_out=h_out,
                               w_out=w_out, wd=wd, out_w=out_w)

    # NOTE: for large images (big P) the flattened spatial axis should get its own
    # grid dimension with a two-pass (accumulate-stats / normalize) scheme so the
    # per-batch block fits v7x's 64 MiB VMEM; at these sizes a whole-P block per
    # batch element is both smallest and fastest.
    y = pl.pallas_call(
        kernel,
        out_shape=jax.ShapeDtypeStruct((n, c_out, out_w), x_nchw.dtype),
        grid_spec=pltpu.PrefetchScalarGridSpec(
            num_scalar_prefetch=0,
            grid=(n,),
            in_specs=[
                pl.BlockSpec((1, 4, c_in, l_in), lambda b: (b, 0, 0, 0)),
                pl.BlockSpec((KH * KW, c_out, c_in), lambda b: (0, 0, 0)),
            ],
            out_specs=pl.BlockSpec((1, c_out, out_w), lambda b: (b, 0, 0)),
        ),
        compiler_params=pltpu.CompilerParams(
            dimension_semantics=("parallel",),
            vmem_limit_bytes=vmem_limit,
        ),
    )(xd, w_taps)                                            # (N, C_out, out_w)

    # Crop the lane-padded flattened spatial axis back to (h_out, w_out).  The
    # result is already NCHW — no output transpose needed.
    y = y[:, :, : h_out * wd].reshape(n, c_out, h_out, wd)[:, :, :, :w_out]
    return y


def _reference(x_nchw, weight, bias):
    """Pure-JAX reference: ReLU -> Conv2d(+bias) -> InstanceNorm2d."""
    x = jnp.maximum(x_nchw, 0.0)
    y = jax.lax.conv_general_dilated(
        x, weight,
        window_strides=(STRIDE, STRIDE),
        padding=((PAD, PAD), (PAD, PAD)),
        dimension_numbers=("NCHW", "OIHW", "NCHW"),
    ) + bias[None, :, None, None]
    mean = jnp.mean(y, axis=(2, 3), keepdims=True)
    var = jnp.mean((y - mean) ** 2, axis=(2, 3), keepdims=True)
    return (y - mean) / jnp.sqrt(var + EPS)


if __name__ == "__main__":
    key = jax.random.PRNGKey(0)
    k_x, k_w, k_b = jax.random.split(key, 3)

    N, C_IN, C_OUT, H, W = 2, 4, 8, 16, 16

    x = jax.random.normal(k_x, (N, C_IN, H, W), dtype=jnp.float32)
    # Deterministic synthetic parameters (shapes match nn.Conv2d(C_IN, C_OUT, 4, 2, 1)).
    fan_in = C_IN * KH * KW
    bound = 1.0 / float(fan_in) ** 0.5
    weight = jax.random.uniform(k_w, (C_OUT, C_IN, KH, KW), jnp.float32, -bound, bound)
    bias = jax.random.uniform(k_b, (C_OUT,), jnp.float32, -bound, bound)

    out = jax.block_until_ready(conv_2d_forward(x, weight, bias))
    assert out.shape == (N, C_OUT, H // 2, W // 2), out.shape

    ref = jax.block_until_ready(_reference(x, weight, bias))
    max_err = float(jnp.max(jnp.abs(out - ref)))
    assert jnp.allclose(out, ref, atol=1e-2, rtol=1e-2), max_err

    print("KERNEL_OK")
</pallas_src>

<mosaic_0001>
module attributes {stable_mosaic.version = 11 : i64} {
  func.func @_conv2d_in_kernel(%arg0: i32, %arg1: memref<1x4x4x144xf32, #tpu.memory_space<vmem>>, %arg2: memref<16x8x4xf32, #tpu.memory_space<vmem>>, %arg3: memref<1x8x128xf32, #tpu.memory_space<vmem>>) attributes {dimension_semantics = [#tpu.dimension_semantics<parallel>], iteration_bounds = array<i64: 2>, scalar_prefetch = 0 : i64, scratch_operands = 0 : i64, tpu.core_type = #tpu.core_type<tc>, window_params = [{transform_indices = @transform_0, window_bounds = array<i64: 1, 4, 4, 144>}, {pipeline_mode = #tpu.pipeline_mode<synchronous>, transform_indices = @transform_1, window_bounds = array<i64: 16, 8, 4>}, {transform_indices = @transform_2, window_bounds = array<i64: 1, 8, 128>}]} {
    %0 = tpu.iota {dimensions = array<i32: 1>} : vector<1x128xi32>
    %c72_i32 = arith.constant 72 : i32
    %1 = vector.broadcast %c72_i32 : i32 to vector<1x128xi32>
    %2 = arith.cmpi slt, %0, %1 : vector<1x128xi32>
    %c9_i32 = arith.constant 9 : i32
    %c0_i32 = arith.constant 0 : i32
    %3 = arith.cmpi eq, %c9_i32, %c0_i32 : i32
    %c1_i32 = arith.constant 1 : i32
    %4 = arith.select %3, %c1_i32, %c9_i32 : i32
    %5 = vector.broadcast %4 : i32 to vector<1x128xi32>
    %6 = arith.remsi %0, %5 : vector<1x128xi32>
    %c0_i32_0 = arith.constant 0 : i32
    %7 = vector.broadcast %c0_i32_0 : i32 to vector<1x128xi32>
    %8 = arith.cmpi ne, %6, %7 : vector<1x128xi32>
    %c0_i32_1 = arith.constant 0 : i32
    %9 = vector.broadcast %c0_i32_1 : i32 to vector<1x128xi32>
    %10 = arith.cmpi slt, %6, %9 : vector<1x128xi32>
    %c0_i32_2 = arith.constant 0 : i32
    %11 = arith.cmpi slt, %4, %c0_i32_2 : i32
    %12 = vector.broadcast %11 : i1 to vector<1x128xi1>
    %13 = vector.broadcast %12 : vector<1x128xi1> to vector<1x128xi1>
    %14 = arith.xori %10, %13 : vector<1x128xi1>
    %15 = arith.andi %14, %8 : vector<1x128xi1>
    %16 = vector.broadcast %4 : i32 to vector<1x128xi32>
    %17 = arith.addi %6, %16 : vector<1x128xi32>
    %18 = arith.select %15, %17, %6 : vector<1x128xi1>, vector<1x128xi32>
    %c8_i32 = arith.constant 8 : i32
    %19 = vector.broadcast %c8_i32 : i32 to vector<1x128xi32>
    %20 = arith.cmpi slt, %18, %19 : vector<1x128xi32>
    %21 = arith.andi %2, %20 : vector<1x128xi1>
    %22 = arith.extui %21 : vector<1x128xi1> to vector<1x128xi32>
    %23 = arith.sitofp %22 : vector<1x128xi32> to vector<1x128xf32>
    %cst = arith.constant 0.000000e+00 : f32
    %24 = vector.broadcast %cst : f32 to vector<8x128xf32>
    %c0 = arith.constant 0 : index
    %c0_3 = arith.constant 0 : index
    %c0_4 = arith.constant 0 : index
    %c0_5 = arith.constant 0 : index
    %25 = vector.load %arg1[%c0, %c0_3, %c0_4, %c0_5] : memref<1x4x4x144xf32, #tpu.memory_space<vmem>>, vector<1x1x4x128xf32>
    %26 = vector.shape_cast %25 : vector<1x1x4x128xf32> to vector<4x128xf32>
    %cst_6 = arith.constant 0.000000e+00 : f32
    %27 = vector.broadcast %cst_6 : f32 to vector<4x128xf32>
    %28 = arith.maximumf %26, %27 : vector<4x128xf32>
    %c0_7 = arith.constant 0 : index
    %c0_8 = arith.constant 0 : index
    %c0_9 = arith.constant 0 : index
    %29 = vector.load %arg2[%c0_7, %c0_8, %c0_9] : memref<16x8x4xf32, #tpu.memory_space<vmem>>, vector<1x8x4xf32>
    %30 = vector.shape_cast %29 : vector<1x8x4xf32> to vector<8x4xf32>
    %cst_10 = arith.constant dense<0.000000e+00> : vector<8x128xf32>
    %31 = tpu.matmul %30, %28, %cst_10 {dimension_numbers = #tpu.dot_dimension_numbers<[1], [0], [0], [1], [0, 0, 1, 1], [], []>} : vector<8x4xf32>, vector<4x128xf32>, vector<8x128xf32> -> vector<8x128xf32>
    %32 = arith.addf %24, %31 : vector<8x128xf32>
    %c0_11 = arith.constant 0 : index
    %c1 = arith.constant 1 : index
    %c0_12 = arith.constant 0 : index
    %c0_13 = arith.constant 0 : index
    %33 = vector.load %arg1[%c0_11, %c1, %c0_12, %c0_13] : memref<1x4x4x144xf32, #tpu.memory_space<vmem>>, vector<1x1x4x128xf32>
    %34 = vector.shape_cast %33 : vector<1x1x4x128xf32> to vector<4x128xf32>
    %cst_14 = arith.constant 0.000000e+00 : f32
    %35 = vector.broadcast %cst_14 : f32 to vector<4x128xf32>
    %36 = arith.maximumf %34, %35 : vector<4x128xf32>
    %c1_15 = arith.constant 1 : index
    %c0_16 = arith.constant 0 : index
    %c0_17 = arith.constant 0 : index
    %37 = vector.load %arg2[%c1_15, %c0_16, %c0_17] : memref<16x8x4xf32, #tpu.memory_space<vmem>>, vector<1x8x4xf32>
    %38 = vector.shape_cast %37 : vector<1x8x4xf32> to vector<8x4xf32>
    %cst_18 = arith.constant dense<0.000000e+00> : vector<8x128xf32>
    %39 = tpu.matmul %38, %36, %cst_18 {dimension_numbers = #tpu.dot_dimension_numbers<[1], [0], [0], [1], [0, 0, 1, 1], [], []>} : vector<8x4xf32>, vector<4x128xf32>, vector<8x128xf32> -> vector<8x128xf32>
    %40 = arith.addf %32, %39 : vector<8x128xf32>
    %c0_19 = arith.constant 0 : index
    %c0_20 = arith.constant 0 : index
    %c0_21 = arith.constant 0 : index
    %c1_22 = arith.constant 1 : index
    %41 = vector.load %arg1[%c0_19, %c0_20, %c0_21, %c1_22] : memref<1x4x4x144xf32, #tpu.memory_space<vmem>>, vector<1x1x4x128xf32>
    %42 = vector.shape_cast %41 : vector<1x1x4x128xf32> to vector<4x128xf32>
    %cst_23 = arith.constant 0.000000e+00 : f32
    %43 = vector.broadcast %cst_23 : f32 to vector<4x128xf32>
    %44 = arith.maximumf %42, %43 : vector<4x128xf32>
    %c2 = arith.constant 2 : index
    %c0_24 = arith.constant 0 : index
    %c0_25 = arith.constant 0 : index
    %45 = vector.load %arg2[%c2, %c0_24, %c0_25] : memref<16x8x4xf32, #tpu.memory_space<vmem>>, vector<1x8x4xf32>
    %46 = vector.shape_cast %45 : vector<1x8x4xf32> to vector<8x4xf32>
    %cst_26 = arith.constant dense<0.000000e+00> : vector<8x128xf32>
    %47 = tpu.matmul %46, %44, %cst_26 {dimension_numbers = #tpu.dot_dimension_numbers<[1], [0], [0], [1], [0, 0, 1, 1], [], []>} : vector<8x4xf32>, vector<4x128xf32>, vector<8x128xf32> -> vector<8x128xf32>
    %48 = arith.addf %40, %47 : vector<8x128xf32>
    %c0_27 = arith.constant 0 : index
    %c1_28 = arith.constant 1 : index
    %c0_29 = arith.constant 0 : index
    %c1_30 = arith.constant 1 : index
    %49 = vector.load %arg1[%c0_27, %c1_28, %c0_29, %c1_30] : memref<1x4x4x144xf32, #tpu.memory_space<vmem>>, vector<1x1x4x128xf32>
    %50 = vector.shape_cast %49 : vector<1x1x4x128xf32> to vector<4x128xf32>
    %cst_31 = arith.constant 0.000000e+00 : f32
    %51 = vector.broadcast %cst_31 : f32 to vector<4x128xf32>
    %52 = arith.maximumf %50, %51 : vector<4x128xf32>
    %c3 = arith.constant 3 : index
    %c0_32 = arith.constant 0 : index
    %c0_33 = arith.constant 0 : index
    %53 = vector.load %arg2[%c3, %c0_32, %c0_33] : memref<16x8x4xf32, #tpu.memory_space<vmem>>, vector<1x8x4xf32>
    %54 = vector.shape_cast %53 : vector<1x8x4xf32> to vector<8x4xf32>
    %cst_34 = arith.constant dense<0.000000e+00> : vector<8x128xf32>
    %55 = tpu.matmul %54, %52, %cst_34 {dimension_numbers = #tpu.dot_dimension_numbers<[1], [0], [0], [1], [0, 0, 1, 1], [], []>} : vector<8x4xf32>, vector<4x128xf32>, vector<8x128xf32> -> vector<8x128xf32>
    %56 = arith.addf %48, %55 : vector<8x128xf32>
    %c0_35 = arith.constant 0 : index
    %c2_36 = arith.constant 2 : index
    %c0_37 = arith.constant 0 : index
    %c0_38 = arith.constant 0 : index
    %57 = vector.load %arg1[%c0_35, %c2_36, %c0_37, %c0_38] : memref<1x4x4x144xf32, #tpu.memory_space<vmem>>, vector<1x1x4x128xf32>
    %58 = vector.shape_cast %57 : vector<1x1x4x128xf32> to vector<4x128xf32>
    %cst_39 = arith.constant 0.000000e+00 : f32
    %59 = vector.broadcast %cst_39 : f32 to vector<4x128xf32>
    %60 = arith.maximumf %58, %59 : vector<4x128xf32>
    %c4 = arith.constant 4 : index
    %c0_40 = arith.constant 0 : index
    %c0_41 = arith.constant 0 : index
    %61 = vector.load %arg2[%c4, %c0_40, %c0_41] : memref<16x8x4xf32, #tpu.memory_space<vmem>>, vector<1x8x4xf32>
    %62 = vector.shape_cast %61 : vector<1x8x4xf32> to vector<8x4xf32>
    %cst_42 = arith.constant dense<0.000000e+00> : vector<8x128xf32>
    %63 = tpu.matmul %62, %60, %cst_42 {dimension_numbers = #tpu.dot_dimension_numbers<[1], [0], [0], [1], [0, 0, 1, 1], [], []>} : vector<8x4xf32>, vector<4x128xf32>, vector<8x128xf32> -> vector<8x128xf32>
    %64 = arith.addf %56, %63 : vector<8x128xf32>
    %c0_43 = arith.constant 0 : index
    %c3_44 = arith.constant 3 : index
    %c0_45 = arith.constant 0 : index
    %c0_46 = arith.constant 0 : index
    %65 = vector.load %arg1[%c0_43, %c3_44, %c0_45, %c0_46] : memref<1x4x4x144xf32, #tpu.memory_space<vmem>>, vector<1x1x4x128xf32>
    %66 = vector.shape_cast %65 : vector<1x1x4x128xf32> to vector<4x128xf32>
    %cst_47 = arith.constant 0.000000e+00 : f32
    %67 = vector.broadcast %cst_47 : f32 to vector<4x128xf32>
    %68 = arith.maximumf %66, %67 : vector<4x128xf32>
    %c5 = arith.constant 5 : index
    %c0_48 = arith.constant 0 : index
    %c0_49 = arith.constant 0 : index
    %69 = vector.load %arg2[%c5, %c0_48, %c0_49] : memref<16x8x4xf32, #tpu.memory_space<vmem>>, vector<1x8x4xf32>
    %70 = vector.shape_cast %69 : vector<1x8x4xf32> to vector<8x4xf32>
    %cst_50 = arith.constant dense<0.000000e+00> : vector<8x128xf32>
    %71 = tpu.matmul %70, %68, %cst_50 {dimension_numbers = #tpu.dot_dimension_numbers<[1], [0], [0], [1], [0, 0, 1, 1], [], []>} : vector<8x4xf32>, vector<4x128xf32>, vector<8x128xf32> -> vector<8x128xf32>
    %72 = arith.addf %64, %71 : vector<8x128xf32>
    %c0_51 = arith.constant 0 : index
    %c2_52 = arith.constant 2 : index
    %c0_53 = arith.constant 0 : index
    %c1_54 = arith.constant 1 : index
    %73 = vector.load %arg1[%c0_51, %c2_52, %c0_53, %c1_54] : memref<1x4x4x144xf32, #tpu.memory_space<vmem>>, vector<1x1x4x128xf32>
    %74 = vector.shape_cast %73 : vector<1x1x4x128xf32> to vector<4x128xf32>
    %cst_55 = arith.constant 0.000000e+00 : f32
    %75 = vector.broadcast %cst_55 : f32 to vector<4x128xf32>
    %76 = arith.maximumf %74, %75 : vector<4x128xf32>
    %c6 = arith.constant 6 : index
    %c0_56 = arith.constant 0 : index
    %c0_57 = arith.constant 0 : index
    %77 = vector.load %arg2[%c6, %c0_56, %c0_57] : memref<16x8x4xf32, #tpu.memory_space<vmem>>, vector<1x8x4xf32>
    %78 = vector.shape_cast %77 : vector<1x8x4xf32> to vector<8x4xf32>
    %cst_58 = arith.constant dense<0.000000e+00> : vector<8x128xf32>
    %79 = tpu.matmul %78, %76, %cst_58 {dimension_numbers = #tpu.dot_dimension_numbers<[1], [0], [0], [1], [0, 0, 1, 1], [], []>} : vector<8x4xf32>, vector<4x128xf32>, vector<8x128xf32> -> vector<8x128xf32>
    %80 = arith.addf %72, %79 : vector<8x128xf32>
    %c0_59 = arith.constant 0 : index
    %c3_60 = arith.constant 3 : index
    %c0_61 = arith.constant 0 : index
    %c1_62 = arith.constant 1 : index
    %81 = vector.load %arg1[%c0_59, %c3_60, %c0_61, %c1_62] : memref<1x4x4x144xf32, #tpu.memory_space<vmem>>, vector<1x1x4x128xf32>
    %82 = vector.shape_cast %81 : vector<1x1x4x128xf32> to vector<4x128xf32>
    %cst_63 = arith.constant 0.000000e+00 : f32
    %83 = vector.broadcast %cst_63 : f32 to vector<4x128xf32>
    %84 = arith.maximumf %82, %83 : vector<4x128xf32>
    %c7 = arith.constant 7 : index
    %c0_64 = arith.constant 0 : index
    %c0_65 = arith.constant 0 : index
    %85 = vector.load %arg2[%c7, %c0_64, %c0_65] : memref<16x8x4xf32, #tpu.memory_space<vmem>>, vector<1x8x4xf32>
    %86 = vector.shape_cast %85 : vector<1x8x4xf32> to vector<8x4xf32>
    %cst_66 = arith.constant dense<0.000000e+00> : vector<8x128xf32>
    %87 = tpu.matmul %86, %84, %cst_66 {dimension_numbers = #tpu.dot_dimension_numbers<[1], [0], [0], [1], [0, 0, 1, 1], [], []>} : vector<8x4xf32>, vector<4x128xf32>, vector<8x128xf32> -> vector<8x128xf32>
    %88 = arith.addf %80, %87 : vector<8x128xf32>
    %c0_67 = arith.constant 0 : index
    %c0_68 = arith.constant 0 : index
    %c0_69 = arith.constant 0 : index
    %c9 = arith.constant 9 : index
    %89 = vector.load %arg1[%c0_67, %c0_68, %c0_69, %c9] : memref<1x4x4x144xf32, #tpu.memory_space<vmem>>, vector<1x1x4x128xf32>
    %90 = vector.shape_cast %89 : vector<1x1x4x128xf32> to vector<4x128xf32>
    %cst_70 = arith.constant 0.000000e+00 : f32
    %91 = vector.broadcast %cst_70 : f32 to vector<4x128xf32>
    %92 = arith.maximumf %90, %91 : vector<4x128xf32>
    %c8 = arith.constant 8 : index
    %c0_71 = arith.constant 0 : index
    %c0_72 = arith.constant 0 : index
    %93 = vector.load %arg2[%c8, %c0_71, %c0_72] : memref<16x8x4xf32, #tpu.memory_space<vmem>>, vector<1x8x4xf32>
    %94 = vector.shape_cast %93 : vector<1x8x4xf32> to vector<8x4xf32>
    %cst_73 = arith.constant dense<0.000000e+00> : vector<8x128xf32>
    %95 = tpu.matmul %94, %92, %cst_73 {dimension_numbers = #tpu.dot_dimension_numbers<[1], [0], [0], [1], [0, 0, 1, 1], [], []>} : vector<8x4xf32>, vector<4x128xf32>, vector<8x128xf32> -> vector<8x128xf32>
    %96 = arith.addf %88, %95 : vector<8x128xf32>
    %c0_74 = arith.constant 0 : index
    %c1_75 = arith.constant 1 : index
    %c0_76 = arith.constant 0 : index
    %c9_77 = arith.constant 9 : index
    %97 = vector.load %arg1[%c0_74, %c1_75, %c0_76, %c9_77] : memref<1x4x4x144xf32, #tpu.memory_space<vmem>>, vector<1x1x4x128xf32>
    %98 = vector.shape_cast %97 : vector<1x1x4x128xf32> to vector<4x128xf32>
    %cst_78 = arith.constant 0.000000e+00 : f32
    %99 = vector.broadcast %cst_78 : f32 to vector<4x128xf32>
    %100 = arith.maximumf %98, %99 : vector<4x128xf32>
    %c9_79 = arith.constant 9 : index
    %c0_80 = arith.constant 0 : index
    %c0_81 = arith.constant 0 : index
    %101 = vector.load %arg2[%c9_79, %c0_80, %c0_81] : memref<16x8x4xf32, #tpu.memory_space<vmem>>, vector<1x8x4xf32>
    %102 = vector.shape_cast %101 : vector<1x8x4xf32> to vector<8x4xf32>
    %cst_82 = arith.constant dense<0.000000e+00> : vector<8x128xf32>
    %103 = tpu.matmul %102, %100, %cst_82 {dimension_numbers = #tpu.dot_dimension_numbers<[1], [0], [0], [1], [0, 0, 1, 1], [], []>} : vector<8x4xf32>, vector<4x128xf32>, vector<8x128xf32> -> vector<8x128xf32>
    %104 = arith.addf %96, %103 : vector<8x128xf32>
    %c0_83 = arith.constant 0 : index
    %c0_84 = arith.constant 0 : index
    %c0_85 = arith.constant 0 : index
    %c10 = arith.constant 10 : index
    %105 = vector.load %arg1[%c0_83, %c0_84, %c0_85, %c10] : memref<1x4x4x144xf32, #tpu.memory_space<vmem>>, vector<1x1x4x128xf32>
    %106 = vector.shape_cast %105 : vector<1x1x4x128xf32> to vector<4x128xf32>
    %cst_86 = arith.constant 0.000000e+00 : f32
    %107 = vector.broadcast %cst_86 : f32 to vector<4x128xf32>
    %108 = arith.maximumf %106, %107 : vector<4x128xf32>
    %c10_87 = arith.constant 10 : index
    %c0_88 = arith.constant 0 : index
    %c0_89 = arith.constant 0 : index
    %109 = vector.load %arg2[%c10_87, %c0_88, %c0_89] : memref<16x8x4xf32, #tpu.memory_space<vmem>>, vector<1x8x4xf32>
    %110 = vector.shape_cast %109 : vector<1x8x4xf32> to vector<8x4xf32>
    %cst_90 = arith.constant dense<0.000000e+00> : vector<8x128xf32>
    %111 = tpu.matmul %110, %108, %cst_90 {dimension_numbers = #tpu.dot_dimension_numbers<[1], [0], [0], [1], [0, 0, 1, 1], [], []>} : vector<8x4xf32>, vector<4x128xf32>, vector<8x128xf32> -> vector<8x128xf32>
    %112 = arith.addf %104, %111 : vector<8x128xf32>
    %c0_91 = arith.constant 0 : index
    %c1_92 = arith.constant 1 : index
    %c0_93 = arith.constant 0 : index
    %c10_94 = arith.constant 10 : index
    %113 = vector.load %arg1[%c0_91, %c1_92, %c0_93, %c10_94] : memref<1x4x4x144xf32, #tpu.memory_space<vmem>>, vector<1x1x4x128xf32>
    %114 = vector.shape_cast %113 : vector<1x1x4x128xf32> to vector<4x128xf32>
    %cst_95 = arith.constant 0.000000e+00 : f32
    %115 = vector.broadcast %cst_95 : f32 to vector<4x128xf32>
    %116 = arith.maximumf %114, %115 : vector<4x128xf32>
    %c11 = arith.constant 11 : index
    %c0_96 = arith.constant 0 : index
    %c0_97 = arith.constant 0 : index
    %117 = vector.load %arg2[%c11, %c0_96, %c0_97] : memref<16x8x4xf32, #tpu.memory_space<vmem>>, vector<1x8x4xf32>
    %118 = vector.shape_cast %117 : vector<1x8x4xf32> to vector<8x4xf32>
    %cst_98 = arith.constant dense<0.000000e+00> : vector<8x128xf32>
    %119 = tpu.matmul %118, %116, %cst_98 {dimension_numbers = #tpu.dot_dimension_numbers<[1], [0], [0], [1], [0, 0, 1, 1], [], []>} : vector<8x4xf32>, vector<4x128xf32>, vector<8x128xf32> -> vector<8x128xf32>
    %120 = arith.addf %112, %119 : vector<8x128xf32>
    %c0_99 = arith.constant 0 : index
    %c2_100 = arith.constant 2 : index
    %c0_101 = arith.constant 0 : index
    %c9_102 = arith.constant 9 : index
    %121 = vector.load %arg1[%c0_99, %c2_100, %c0_101, %c9_102] : memref<1x4x4x144xf32, #tpu.memory_space<vmem>>, vector<1x1x4x128xf32>
    %122 = vector.shape_cast %121 : vector<1x1x4x128xf32> to vector<4x128xf32>
    %cst_103 = arith.constant 0.000000e+00 : f32
    %123 = vector.broadcast %cst_103 : f32 to vector<4x128xf32>
    %124 = arith.maximumf %122, %123 : vector<4x128xf32>
    %c12 = arith.constant 12 : index
    %c0_104 = arith.constant 0 : index
    %c0_105 = arith.constant 0 : index
    %125 = vector.load %arg2[%c12, %c0_104, %c0_105] : memref<16x8x4xf32, #tpu.memory_space<vmem>>, vector<1x8x4xf32>
    %126 = vector.shape_cast %125 : vector<1x8x4xf32> to vector<8x4xf32>
    %cst_106 = arith.constant dense<0.000000e+00> : vector<8x128xf32>
    %127 = tpu.matmul %126, %124, %cst_106 {dimension_numbers = #tpu.dot_dimension_numbers<[1], [0], [0], [1], [0, 0, 1, 1], [], []>} : vector<8x4xf32>, vector<4x128xf32>, vector<8x128xf32> -> vector<8x128xf32>
    %128 = arith.addf %120, %127 : vector<8x128xf32>
    %c0_107 = arith.constant 0 : index
    %c3_108 = arith.constant 3 : index
    %c0_109 = arith.constant 0 : index
    %c9_110 = arith.constant 9 : index
    %129 = vector.load %arg1[%c0_107, %c3_108, %c0_109, %c9_110] : memref<1x4x4x144xf32, #tpu.memory_space<vmem>>, vector<1x1x4x128xf32>
    %130 = vector.shape_cast %129 : vector<1x1x4x128xf32> to vector<4x128xf32>
    %cst_111 = arith.constant 0.000000e+00 : f32
    %131 = vector.broadcast %cst_111 : f32 to vector<4x128xf32>
    %132 = arith.maximumf %130, %131 : vector<4x128xf32>
    %c13 = arith.constant 13 : index
    %c0_112 = arith.constant 0 : index
    %c0_113 = arith.constant 0 : index
    %133 = vector.load %arg2[%c13, %c0_112, %c0_113] : memref<16x8x4xf32, #tpu.memory_space<vmem>>, vector<1x8x4xf32>
    %134 = vector.shape_cast %133 : vector<1x8x4xf32> to vector<8x4xf32>
    %cst_114 = arith.constant dense<0.000000e+00> : vector<8x128xf32>
    %135 = tpu.matmul %134, %132, %cst_114 {dimension_numbers = #tpu.dot_dimension_numbers<[1], [0], [0], [1], [0, 0, 1, 1], [], []>} : vector<8x4xf32>, vector<4x128xf32>, vector<8x128xf32> -> vector<8x128xf32>
    %136 = arith.addf %128, %135 : vector<8x128xf32>
    %c0_115 = arith.constant 0 : index
    %c2_116 = arith.constant 2 : index
    %c0_117 = arith.constant 0 : index
    %c10_118 = arith.constant 10 : index
    %137 = vector.load %arg1[%c0_115, %c2_116, %c0_117, %c10_118] : memref<1x4x4x144xf32, #tpu.memory_space<vmem>>, vector<1x1x4x128xf32>
    %138 = vector.shape_cast %137 : vector<1x1x4x128xf32> to vector<4x128xf32>
    %cst_119 = arith.constant 0.000000e+00 : f32
    %139 = vector.broadcast %cst_119 : f32 to vector<4x128xf32>
    %140 = arith.maximumf %138, %139 : vector<4x128xf32>
    %c14 = arith.constant 14 : index
    %c0_120 = arith.constant 0 : index
    %c0_121 = arith.constant 0 : index
    %141 = vector.load %arg2[%c14, %c0_120, %c0_121] : memref<16x8x4xf32, #tpu.memory_space<vmem>>, vector<1x8x4xf32>
    %142 = vector.shape_cast %141 : vector<1x8x4xf32> to vector<8x4xf32>
    %cst_122 = arith.constant dense<0.000000e+00> : vector<8x128xf32>
    %143 = tpu.matmul %142, %140, %cst_122 {dimension_numbers = #tpu.dot_dimension_numbers<[1], [0], [0], [1], [0, 0, 1, 1], [], []>} : vector<8x4xf32>, vector<4x128xf32>, vector<8x128xf32> -> vector<8x128xf32>
    %144 = arith.addf %136, %143 : vector<8x128xf32>
    %c0_123 = arith.constant 0 : index
    %c3_124 = arith.constant 3 : index
    %c0_125 = arith.constant 0 : index
    %c10_126 = arith.constant 10 : index
    %145 = vector.load %arg1[%c0_123, %c3_124, %c0_125, %c10_126] : memref<1x4x4x144xf32, #tpu.memory_space<vmem>>, vector<1x1x4x128xf32>
    %146 = vector.shape_cast %145 : vector<1x1x4x128xf32> to vector<4x128xf32>
    %cst_127 = arith.constant 0.000000e+00 : f32
    %147 = vector.broadcast %cst_127 : f32 to vector<4x128xf32>
    %148 = arith.maximumf %146, %147 : vector<4x128xf32>
    %c15 = arith.constant 15 : index
    %c0_128 = arith.constant 0 : index
    %c0_129 = arith.constant 0 : index
    %149 = vector.load %arg2[%c15, %c0_128, %c0_129] : memref<16x8x4xf32, #tpu.memory_space<vmem>>, vector<1x8x4xf32>
    %150 = vector.shape_cast %149 : vector<1x8x4xf32> to vector<8x4xf32>
    %cst_130 = arith.constant dense<0.000000e+00> : vector<8x128xf32>
    %151 = tpu.matmul %150, %148, %cst_130 {dimension_numbers = #tpu.dot_dimension_numbers<[1], [0], [0], [1], [0, 0, 1, 1], [], []>} : vector<8x4xf32>, vector<4x128xf32>, vector<8x128xf32> -> vector<8x128xf32>
    %152 = arith.addf %144, %151 : vector<8x128xf32>
    %153 = vector.broadcast %23 : vector<1x128xf32> to vector<8x128xf32>
    %154 = arith.mulf %152, %153 : vector<8x128xf32>
    %cst_131 = arith.constant dense<0.000000e+00> : vector<8xf32>
    %155 = vector.multi_reduction <add>, %154, %cst_131 [1] : vector<8x128xf32> to vector<8xf32>
    %156 = vector.shape_cast %155 : vector<8xf32> to vector<8x1xf32>
    %157 = arith.mulf %152, %152 : vector<8x128xf32>
    %158 = vector.broadcast %23 : vector<1x128xf32> to vector<8x128xf32>
    %159 = arith.mulf %157, %158 : vector<8x128xf32>
    %cst_132 = arith.constant dense<0.000000e+00> : vector<8xf32>
    %160 = vector.multi_reduction <add>, %159, %cst_132 [1] : vector<8x128xf32> to vector<8xf32>
    %161 = vector.shape_cast %160 : vector<8xf32> to vector<8x1xf32>
    %cst_133 = arith.constant 6.400000e+01 : f32
    %162 = vector.broadcast %cst_133 : f32 to vector<8x1xf32>
    %163 = arith.divf %156, %162 : vector<8x1xf32>
    %cst_134 = arith.constant 6.400000e+01 : f32
    %164 = vector.broadcast %cst_134 : f32 to vector<8x1xf32>
    %165 = arith.divf %161, %164 : vector<8x1xf32>
    %166 = arith.mulf %163, %163 : vector<8x1xf32>
    %167 = arith.subf %165, %166 : vector<8x1xf32>
    %168 = vector.broadcast %163 : vector<8x1xf32> to vector<8x128xf32>
    %169 = arith.subf %152, %168 : vector<8x128xf32>
    %cst_135 = arith.constant 9.99999974E-6 : f32
    %170 = vector.broadcast %cst_135 : f32 to vector<8x1xf32>
    %171 = arith.addf %167, %170 : vector<8x1xf32>
    %172 = math.rsqrt %171 : vector<8x1xf32>
    %173 = vector.broadcast %172 : vector<8x1xf32> to vector<8x128xf32>
    %174 = arith.mulf %169, %173 : vector<8x128xf32>
    %c0_136 = arith.constant 0 : index
    %c0_137 = arith.constant 0 : index
    %c0_138 = arith.constant 0 : index
    %175 = vector.load %arg3[%c0_136, %c0_137, %c0_138] : memref<1x8x128xf32, #tpu.memory_space<vmem>>, vector<1x8x128xf32>
    %176 = vector.shape_cast %175 : vector<1x8x128xf32> to vector<8x128xf32>
    %177 = vector.shape_cast %174 : vector<8x128xf32> to vector<1x8x128xf32>
    tpu.vector_store %arg3[%c0_136, %c0_137, %c0_138], %177 {strides = array<i32>} : memref<1x8x128xf32, #tpu.memory_space<vmem>>, vector<1x8x128xf32>,
    return
  }
  func.func @transform_0(%arg0: i32) -> (i32, i32, i32, i32) {
    %c0_i32 = arith.constant 0 : i32
    %c0_i32_0 = arith.constant 0 : i32
    %c0_i32_1 = arith.constant 0 : i32
    %c0_i32_2 = arith.constant 0 : i32
    return %arg0, %c0_i32, %c0_i32_0, %c0_i32_1 : i32, i32, i32, i32
  }
  func.func @transform_1(%arg0: i32) -> (i32, i32, i32) {
    %c0_i32 = arith.constant 0 : i32
    %c0_i32_0 = arith.constant 0 : i32
    %c0_i32_1 = arith.constant 0 : i32
    %c0_i32_2 = arith.constant 0 : i32
    return %c0_i32, %c0_i32_0, %c0_i32_1 : i32, i32, i32
  }
  func.func @transform_2(%arg0: i32) -> (i32, i32, i32) {
    %c0_i32 = arith.constant 0 : i32
    %c0_i32_0 = arith.constant 0 : i32
    %c0_i32_1 = arith.constant 0 : i32
    return %arg0, %c0_i32, %c0_i32_0 : i32, i32, i32
  }
}

</mosaic_0001>

<bundles_post_ra>
// kernel: conv_2d_forward.1
= control target key start
LH: loop header
LB: loop body
LE: loop exit
PB: predicated region body
PF: predicated region fallthrough
CT: control target
= control target key end

     0   :  { %s1865_s9 = smov 0   ;;  %s2049_s0 = inlined_call_operand.vmem [shape: f32[2,4,4,144], index: 0, kind: input, shape index: {}]   ;;  %s2050_s1 = inlined_call_operand.vmem [shape: f32[16,8,4], index: 1, kind: input, shape index: {}]   ;;  %s2051_s2 = inlined_call_operand.vmem [shape: f32[2,8,128], index: 2, kind: output, shape index: {}]  }
   0x1 LB: > { %s1608_s10 = sadd.s32 4294967295, %s1843_s9   ;;  %p1612_p0 = scmp.ge.s32.totalorder %s1843_s9, 1  ;;  %s1843_s9 = sphi %s1865_s9, %s12_s9  }
   0x2   : > { %p112_p1 = scmp.lt.s32.totalorder %s1843_s9, 3 }
   0x4   : > { %p113_p2 = pnand %p1612_p0, %p112_p1 }
   0x5   : > { %p133_p3 = scmp.lt.s32.totalorder (!%p113_p2), %s1608_s10, 1  ;;  %v1845_v0 = vmov (!%p113_p2), 0.0   ;;  %vm1846_vm0 = vmmov (!%p113_p2), 0   ;;  %vm177_vm1 = vcmask (!%p113_p2), 1043456   ;;  %v1618_v7 = vld [vmem:[%s2050_s1 + $0x8] sm:$0xff] (!%p113_p2)  ;;  %vm173_vm2 = vcmask (!%p113_p2), 31744  }
   0x6   : > { %116 = sbr.rel (%p113_p2) target bundleno = 576 (0x240), region = 28  ;;  %1711 = vmatprep.subr.mxu1 (!%p113_p2), %v1845_v0  ;;  %1713 = vmatprep.mubr.msk.f32.mxu1 (!%p113_p2), %vm1846_vm0, %v1845_v0  ;;  %s1847_s17 = smov (!%p113_p2), 119   ;;  %v167_v12 = vld [vmem:[%s2050_s1] sm:$0xff] (!%p113_p2)  ;;  %vm850_vm3 = vcmask (!%p113_p2), 973824   ;;  %vm337_vm4 = vcmask (!%p113_p2), 1039360   ;;  %v1623_v28 = vld [vmem:[%s2050_s1 + $0x10] sm:$0xff] (!%p113_p2) }
   0x7   : > { %1751 = vmatprep.subr.mxu0 (!%p113_p2), %v1845_v0  ;;  %1753 = vmatprep.mubr.msk.f32.mxu0 (!%p113_p2), %vm1846_vm0, %v1845_v0  ;;  %s1848_s20 = smov (!%p113_p2), 127   ;;  %s1849_s21 = smov (!%p113_p2), 118   ;;  %v1646_v23 = vld [vmem:[%s2050_s1 + $0x40] sm:$0xff] (!%p113_p2)  ;;  %vm1025_vm5 = vcmask (!%p113_p2), 965632   ;;  %v1650_v32 = vld [vmem:[%s2050_s1 + $0x48] sm:$0xff] (!%p113_p2)  ;;  %v1627_v37 = vld [vmem:[%s2050_s1 + $0x18] sm:$0xff] (!%p113_p2) }
   0x8   : > { %v1653_v42 = vld [vmem:[%s2050_s1 + $0x50] sm:$0xff] (!%p113_p2)  ;;  %v1631_v45 = vld [vmem:[%s2050_s1 + $0x20] sm:$0xff] (!%p113_p2)  ;;  %v1657_v49 = vld [vmem:[%s2050_s1 + $0x58] sm:$0xff] (!%p113_p2) }
   0x9   : > { %v1635_v53 = vld [vmem:[%s2050_s1 + $0x28] sm:$0xff] (!%p113_p2)  ;;  %v1661_v57 = vld [vmem:[%s2050_s1 + $0x60] sm:$0xff] (!%p113_p2)  ;;  %v1639_v61 = vld [vmem:[%s2050_s1 + $0x30] sm:$0xff] (!%p113_p2) }
   0xd   : > { %s2053_s10 = smov (!%p133_p3, %s1608_s10), 1 }
   0xe   : > { %s1678_s11 = sshll.u32 %s2053_s10, 5  ;;  %s1615_s24 = sshll.u32 %s2053_s10, 3 }
   0xf   : > { %s1885_s14 = scalar_lea.vmem %s2049_s0, %s1678_s11  ;;  %s141_s27 = scalar_lea.vmem %s2051_s2, %s1615_s24 }
  0x10   : > { %v1649_v1 = vld [vmem:[%s1885_s14 + $0x8] sm:$0xff]  ;;  %v840_v2 = vld [vmem:[%s1885_s14] sm:$0xff]  ;;  %v1660_v13 = vld [vmem:[%s1885_s14 + $0x10] sm:$0xff] }
  0x11   : > { %v929_v3 = vmax.f32 %v1649_v1, 0.0  ;;  %v841_v4 = vmax.f32 %v840_v2, 0.0  ;;  %v1617_v5 = vld [vmem:[%s1885_s14 + $0x8] sm:$0xf]  ;;  %v165_v8 = vld [vmem:[%s1885_s14] sm:$0xf] }
  0x12   : > { %v170_v6 = vmax.f32 %v1617_v5, 0.0  ;;  %v166_v11 = vmax.f32 %v165_v8, 0.0  ;;  %v1191_v14 = vmax.f32 %v1660_v13, 0.0  ;;  %v1664_v15 = vld [vmem:[%s1885_s14 + $0x18] sm:$0xff]  ;;  %v1630_v34 = vld [vmem:[%s1885_s14 + $0x10] sm:$0xf] }
  0x13   : > { %934 = vrot.lane.b32.xlu1 %v929_v3, %s1847_s17  ;;  %v933_v9 = vcombine.high %v929_v3, %v929_v3  ;;  %846 = vrot.lane.b32.xlu0 %v841_v4, %s1847_s17  ;;  %v845_v10 = vcombine.high %v841_v4, %v841_v4  ;;  %v1278_v17 = vmax.f32 %v1664_v15, 0.0  ;;  %v504_v38 = vmax.f32 %v1630_v34, 0.0  ;;  %v1634_v44 = vld [vmem:[%s1885_s14 + $0x18] sm:$0xf]  ;;  %v1665_v2 = vld [vmem:[%s2050_s1 + $0x68] sm:$0xff] }
  0x14   : > { %1712 = vmatpush3.msk.msra.mxu1 %vm177_vm1, %v170_v6  ;;  %v1195_v16 = vcombine.high %v1191_v14, %v1191_v14  ;;  %v586_v48 = vmax.f32 %v1634_v44, 0.0 }
  0x15   : > { %1714 = vmatmul.mubr.msk.f32.vlgmr.msra.gmra.mrb[0].mxu1 %vm173_vm2, %v1618_v7  ;;  %1716 = vmatprep.subr.mxu1 %v1845_v0  ;;  %v1282_v18 = vcombine.high %v1278_v17, %v1278_v17  ;;  %v1669_v7 = vld [vmem:[%s2050_s1 + $0x70] sm:$0xff] }
  0x16   : > { %1717 = vmatpush3.msk.msra.mxu1 %vm177_vm1, %v166_v11  ;;  %1718 = vmatprep.mubr.msk.f32.mxu1 %vm1846_vm0, %v1845_v0 }
  0x17   : > { %936 = vrot.lane.b32.xlu1 %v933_v9, %s1847_s17  ;;  %848 = vrot.lane.b32.xlu0 %v845_v10, %s1847_s17 }
  0x18   : > { %1721 = vmatprep.subr.mxu1 %v1845_v0 }
  0x1b   : > { %333 = vrot.lane.b32.xlu0 %v841_v4, %s1848_s20  ;;  %335 = vrot.lane.b32.xlu1 %v845_v10, %s1848_s20 }
  0x1d   : > { %1719 = vmatmul.mubr.msk.f32.vlgmr.msra.gmra.mrb[0].mxu1 %vm173_vm2, %v167_v12 }
  0x1e   : > { %1723 = vmatprep.mubr.msk.f32.mxu1 %vm1846_vm0, %v1845_v0 }
  0x1f   : > { %1021 = vrot.lane.b32.xlu0 %v841_v4, %s1849_s21  ;;  %1023 = vrot.lane.b32.xlu1 %v845_v10, %s1849_s21  ;;  %v1643_v4 = vld [vmem:[%s2050_s1 + $0x38] sm:$0xff]  ;;  %v142_v10 = vlaneseq }
  0x21   : > { %v143_v11 = vand.u32 127, %v142_v10 }
  0x23   : > { %421 = vrot.lane.b32.xlu0 %v929_v3, %s1848_s20  ;;  %423 = vrot.lane.b32.xlu1 %v933_v9, %s1848_s20  ;;  %v2037_v12 = vmul.u32.u64.low 3817748708, %v143_v11  ;;  %v2038_v13 = vmul.u32.u64.high 3817748708, %v143_v11, %v2037_v12  ;;  %vm144_vm9 = vcmp.lt.s32.totalorder %v143_v11, 72 }
  0x27   : > { %1109 = vrot.lane.b32.xlu0 %v929_v3, %s1849_s21  ;;  %1111 = vrot.lane.b32.xlu1 %v933_v9, %s1849_s21  ;;  %v1673_v9 = vld [vmem:[%s2050_s1 + $0x78] sm:$0xff] }
  0x2b   : > { %1196 = vrot.lane.b32.xlu0 %v1191_v14, %s1847_s17  ;;  %1198 = vrot.lane.b32.xlu1 %v1195_v16, %s1847_s17 }
  0x2f   : > { %1283 = vrot.lane.b32.xlu0 %v1278_v17, %s1847_s17  ;;  %1285 = vrot.lane.b32.xlu1 %v1282_v18, %s1847_s17 }
  0x33   : > { %672 = vrot.lane.b32.xlu0 %v1191_v14, %s1848_s20  ;;  %674 = vrot.lane.b32.xlu1 %v1195_v16, %s1848_s20 }
  0x37   : > { %1370 = vrot.lane.b32.xlu0 %v1191_v14, %s1849_s21  ;;  %1372 = vrot.lane.b32.xlu1 %v1195_v16, %s1849_s21  ;;  %v151_v14 = vshrl.u32 %v2038_v13, 3 }
  0x39   : > { %v152_v15 = vmul.u32 9, %v151_v14 }
  0x3b   : > { %759 = vrot.lane.b32.xlu0 %v1278_v17, %s1848_s20  ;;  %761 = vrot.lane.b32.xlu1 %v1282_v18, %s1848_s20  ;;  %v153_v16 = vsub.s32 %v143_v11, %v152_v15 }
  0x3d   : > { %vm156_vm6 = vcmp.ne.s32.totalorder %v153_v16, 0  ;;  %vm157_vm7 = vcmp.lt.s32.totalorder %v153_v16, 0 }
  0x3e   : > { %vm158_vm8 = vmand %vm157_vm7, %vm156_vm6 }
  0x3f   : > { %1457 = vrot.lane.b32.xlu0 %v1278_v17, %s1849_s21  ;;  %1459 = vrot.lane.b32.xlu1 %v1282_v18, %s1849_s21  ;;  %v159_v17 = vadd.s32 9, %v153_v16 }
  0x85   : > { %v935_v19 = vpop.permute.xlu1 %934  ;;  %v847_v20 = vpop.permute.xlu0 %846 }
  0x89   : > { %v937_v21 = vpop.permute.xlu1 %936  ;;  %v849_v22 = vpop.permute.xlu0 %848 }
  0x8a   : > { %v938_v24 = vsel %vm850_vm3, %v935_v19, %v937_v21  ;;  %v851_v25 = vsel %vm850_vm3, %v847_v20, %v849_v22  ;;  %v160_v20 = vsel %vm158_vm8, %v159_v17, %v153_v16 }
  0x8b   : > { %1752 = vmatpush3.msk.msra.mxu0 %vm177_vm1, %v851_v25  ;;  %vm161_vm10 = vcmp.lt.s32.totalorder %v160_v20, 8 }
  0x8c   : > { %1754 = vmatmul.mubr.msk.f32.vlgmr.msra.gmra.mrb[0].mxu0 %vm173_vm2, %v1646_v23  ;;  %1756 = vmatprep.subr.mxu0 %v1845_v0  ;;  %vm162_vm11 = vmand %vm144_vm9, %vm161_vm10 }
  0x8d   : > { %1757 = vmatpush3.msk.msra.mxu0 %vm177_vm1, %v938_v24  ;;  %v334_v26 = vpop.permute.xlu0 %333  ;;  %v336_v27 = vpop.permute.xlu1 %335  ;;  %1758 = vmatprep.mubr.msk.f32.mxu0 %vm1846_vm0, %v1845_v0  ;;  %v1616_v22 = vsel %vm162_vm11, 1.0, %v1845_v0 }
  0x8e   : > { %v338_v29 = vsel %vm337_vm4, %v334_v26, %v336_v27  ;;  %1761 = vmatprep.subr.mxu0 %v1845_v0 }
  0x8f   : > { %1722 = vmatpush3.msk.msra.mxu1 %vm177_vm1, %v338_v29 }
  0x90   : > { %1724 = vmatmul.mubr.msk.f32.vlgmr.msra.gmra.mrb[0].mxu1 %vm173_vm2, %v1623_v28  ;;  %1726 = vmatprep.subr.mxu1 %v1845_v0 }
  0x91   : > { %v1022_v30 = vpop.permute.xlu0 %1021  ;;  %v1024_v31 = vpop.permute.xlu1 %1023  ;;  %1728 = vmatprep.mubr.msk.f32.mxu1 %vm1846_vm0, %v1845_v0 }
  0x92   : > { %v1026_v33 = vsel %vm1025_vm5, %v1022_v30, %v1024_v31 }
  0x94   : > { %1759 = vmatmul.mubr.msk.f32.vlgmr.msra.gmra.mrb[0].mxu0 %vm173_vm2, %v1650_v32 }
  0x95   : > { %v422_v35 = vpop.permute.xlu0 %421  ;;  %1762 = vmatpush3.msk.msra.mxu0 %vm177_vm1, %v1026_v33  ;;  %v424_v36 = vpop.permute.xlu1 %423  ;;  %1763 = vmatprep.mubr.msk.f32.mxu0 %vm1846_vm0, %v1845_v0 }
  0x96   : > { %v425_v39 = vsel %vm337_vm4, %v422_v35, %v424_v36  ;;  %1766 = vmatprep.subr.mxu0 %v1845_v0 }
  0x97   : > { %1727 = vmatpush3.msk.msra.mxu1 %vm177_vm1, %v425_v39 }
  0x98   : > { %1729 = vmatmul.mubr.msk.f32.vlgmr.msra.gmra.mrb[0].mxu1 %vm173_vm2, %v1627_v37  ;;  %1731 = vmatprep.subr.mxu1 %v1845_v0 }
  0x99   : > { %v1110_v40 = vpop.permute.xlu0 %1109  ;;  %v1112_v41 = vpop.permute.xlu1 %1111  ;;  %1732 = vmatpush3.msk.msra.mxu1 %vm177_vm1, %v504_v38  ;;  %1733 = vmatprep.mubr.msk.f32.mxu1 %vm1846_vm0, %v1845_v0 }
  0x9a   : > { %v1113_v43 = vsel %vm1025_vm5, %v1110_v40, %v1112_v41  ;;  %1736 = vmatprep.subr.mxu1 %v1845_v0 }
  0x9c   : > { %1764 = vmatmul.mubr.msk.f32.vlgmr.msra.gmra.mrb[0].mxu0 %vm173_vm2, %v1653_v42 }
  0x9d   : > { %1767 = vmatpush3.msk.msra.mxu0 %vm177_vm1, %v1113_v43  ;;  %v1197_v46 = vpop.permute.xlu0 %1196  ;;  %1768 = vmatprep.mubr.msk.f32.mxu0 %vm1846_vm0, %v1845_v0  ;;  %v1199_v47 = vpop.permute.xlu1 %1198 }
  0x9e   : > { %1771 = vmatprep.subr.mxu0 %v1845_v0  ;;  %v1200_v52 = vsel %vm850_vm3, %v1197_v46, %v1199_v47 }
  0xa0   : > { %1734 = vmatmul.mubr.msk.f32.vlgmr.msra.gmra.mrb[0].mxu1 %vm173_vm2, %v1631_v45 }
  0xa1   : > { %1737 = vmatpush3.msk.msra.mxu1 %vm177_vm1, %v586_v48  ;;  %1738 = vmatprep.mubr.msk.f32.mxu1 %vm1846_vm0, %v1845_v0  ;;  %v1284_v50 = vpop.permute.xlu0 %1283  ;;  %v1286_v51 = vpop.permute.xlu1 %1285 }
  0xa2   : > { %1741 = vmatprep.subr.mxu1 %v1845_v0  ;;  %v1287_v60 = vsel %vm850_vm3, %v1284_v50, %v1286_v51 }
  0xa4   : > { %1769 = vmatmul.mubr.msk.f32.vlgmr.msra.gmra.mrb[0].mxu0 %vm173_vm2, %v1657_v49 }
  0xa5   : > { %1772 = vmatpush3.msk.msra.mxu0 %vm177_vm1, %v1200_v52  ;;  %1773 = vmatprep.mubr.msk.f32.mxu0 %vm1846_vm0, %v1845_v0  ;;  %v673_v54 = vpop.permute.xlu0 %672  ;;  %v675_v55 = vpop.permute.xlu1 %674 }
  0xa6   : > { %1776 = vmatprep.subr.mxu0 %v1845_v0  ;;  %v676_v56 = vsel %vm337_vm4, %v673_v54, %v675_v55 }
  0xa8   : > { %1739 = vmatmul.mubr.msk.f32.vlgmr.msra.gmra.mrb[0].mxu1 %vm173_vm2, %v1635_v53 }
  0xa9   : > { %1742 = vmatpush3.msk.msra.mxu1 %vm177_vm1, %v676_v56  ;;  %1743 = vmatprep.mubr.msk.f32.mxu1 %vm1846_vm0, %v1845_v0  ;;  %v1371_v58 = vpop.permute.xlu0 %1370  ;;  %v1373_v59 = vpop.permute.xlu1 %1372 }
  0xaa   : > { %1746 = vmatprep.subr.mxu1 %v1845_v0  ;;  %v1374_v3 = vsel %vm1025_vm5, %v1371_v58, %v1373_v59 }
  0xac   : > { %1774 = vmatmul.mubr.msk.f32.vlgmr.msra.gmra.mrb[0].mxu0 %vm173_vm2, %v1661_v57 }
  0xad   : > { %1777 = vmatpush3.msk.msra.mxu0 %vm177_vm1, %v1287_v60  ;;  %1778 = vmatprep.mubr.msk.f32.mxu0 %vm1846_vm0, %v1845_v0  ;;  %v760_v62 = vpop.permute.xlu0 %759  ;;  %v762_v63 = vpop.permute.xlu1 %761 }
  0xae   : > { %1781 = vmatprep.subr.mxu0 %v1845_v0  ;;  %v763_v1 = vsel %vm337_vm4, %v760_v62, %v762_v63 }
  0xb0   : > { %1744 = vmatmul.mubr.msk.f32.vlgmr.msra.gmra.mrb[0].mxu1 %vm173_vm2, %v1639_v61 }
  0xb1   : > { %1747 = vmatpush3.msk.msra.mxu1 %vm177_vm1, %v763_v1  ;;  %1748 = vmatprep.mubr.msk.f32.mxu1 %vm1846_vm0, %v1845_v0  ;;  %v1458_v5 = vpop.permute.xlu0 %1457  ;;  %v1460_v6 = vpop.permute.xlu1 %1459 }
  0xb2   : > { %v1461_v8 = vsel %vm1025_vm5, %v1458_v5, %v1460_v6 }
  0xb4   : > { %1779 = vmatmul.mubr.msk.f32.vlgmr.msra.gmra.mrb[0].mxu0 %vm173_vm2, %v1665_v2 }
  0xb5   : > { %1782 = vmatpush3.msk.msra.mxu0 %vm177_vm1, %v1374_v3  ;;  %1783 = vmatprep.mubr.msk.f32.mxu0 %vm1846_vm0, %v1845_v0 }
  0xb6   : > { %1786 = vmatprep.subr.mxu0 %v1845_v0 }
  0xb8   : > { %1749 = vmatmul.mubr.msk.f32.vlgmr.msra.gmra.mrb[0].mxu1 %vm173_vm2, %v1643_v4 }
  0xbc   : > { %1784 = vmatmul.mubr.msk.f32.vlgmr.msra.gmra.mrb[0].mxu0 %vm173_vm2, %v1669_v7 }
  0xbd   : > { %1787 = vmatpush3.msk.msra.mxu0 %vm177_vm1, %v1461_v8  ;;  %1788 = vmatprep.mubr.msk.f32.mxu0 %vm1846_vm0, %v1845_v0 }
  0xc4   : > { %1789 = vmatmul.mubr.msk.f32.vlgmr.msra.gmra.mrb[0].mxu0 %vm173_vm2, %v1673_v9 }
 0x18b   : > { %v835_v18 = vpop.f32.mrb[0].mxu1 }
 0x18c   : > { %v1750_v19 = vpop.f32.mrb[1].mxu1 }
 0x197   : > { %v1533_v21 = vpop.f32.mrb[0].mxu0 }
 0x198   : > { %v1791_v23 = vadd.f32 %v1533_v21, %v835_v18  ;;  %v1790_v24 = vpop.f32.mrb[1].mxu0 }
 0x19a   : > { %v1538_v25 = vmul.f32 %v1791_v23, %v1616_v22  ;;  %v1541_v26 = vmul.f32 %v1791_v23, %v1791_v23 }
 0x19c   : > { %1539 = vadd.xlane.f32.xlu0 %v1538_v25  ;;  %v1542_v27 = vmul.f32 %v1616_v22, %v1541_v26 }
 0x19e   : > { %1543 = vadd.xlane.f32.xlu1 %v1542_v27 }
 0x229   : > { %v1540_v28 = vpop.xlane.xlu0 %1539 }
 0x22a   : > { %v1546_v29 = vmul.f32 0.015625, %v1540_v28 }
 0x22b   : > { %v1544_v30 = vpop.xlane.xlu1 %1543 }
 0x22c   : > { %v1548_v31 = vmul.f32 %v1546_v29, %v1546_v29  ;;  %v1547_v32 = vmul.f32 0.015625, %v1544_v30  ;;  %v1550_v35 = vsub.f32 %v1791_v23, %v1546_v29 }
 0x22e   : > { %v1549_v33 = vsub.f32 %v1547_v32, %v1548_v31 }
 0x230   : > { %v1551_v34 = vadd.f32 1e-05, %v1549_v33 }
 0x232   : > { %1835 = vrsqrt.f32 %v1551_v34 }
 0x23c   : > { %v1836_v36 = vpop.eup %1835 }
 0x23d   : > { %v1553_v0 = vmul.f32 %v1836_v36, %v1550_v35 }
 0x23f   : > { %1554 = vst [vmem:[%s141_s27] sm:$0xff] %v1553_v0 }
 0x240 PF: > { %s12_s9 = sadd.s32 1, %s1843_s9  }
 0x241   : > { %p9_p4 = scmp.ge.s32.totalorder %s12_s9, 4  }
 0x243   :  { %11 = sbr.rel (!%p9_p4) target bundleno = 1 (0x1), region = 76 }

</bundles_post_ra>
